<compile_context>
chip_gen: v5e
topology: v5e:2x2
jax: 0.10.0
libtpu: 0.0.40
codegen_flags: <defaults>
</compile_context>

<pallas_src>
import functools

import jax
import jax.numpy as jnp
from jax.experimental import pallas as pl
from jax.experimental.pallas import tpu as pltpu

_LANES = 128


def _round_up(x: int, m: int) -> int:
    return ((x + m - 1) // m) * m


def _choose_tile_b(B: int, tile_b: int) -> int:
    """Pick a batch tile: multiple of 8, >=2 grid steps for big B, avoid ragged tail."""
    if B <= 8:
        return B  # single block; block dim == full array dim is always legal
    t = min(tile_b, _round_up(B, 8))
    # v7x megacore: make sure the "parallel" grid axis has at least 2 steps.
    t = min(t, _round_up(pl.cdiv(B, 2), 8))
    t = max(t, 8)
    # Prefer a tile (multiple of 8) that divides B so the last block isn't nearly empty.
    if B % t != 0:
        for cand in range(t, 7, -8):
            if B % cand == 0:
                t = cand
                break
    return t


def _mlp_kernel(*refs, num_layers: int):
    """Fused MLP. refs = (x_ref, w0, b0, w1, b1, ..., o_ref).

    x/w in bf16 (or f32), MXU accumulates in f32, bias + ReLU in f32; the
    activation is cast back to the weight dtype only for the next MXU pass.
    Hidden activations never leave vregs/VMEM.
    """
    x_ref = refs[0]
    o_ref = refs[-1]
    wb_refs = refs[1:-1]

    h = x_ref[...]
    for i in range(num_layers):
        w = wb_refs[2 * i][...]              # (in_p, out_p), compute dtype
        b = wb_refs[2 * i + 1][...]          # (1, out_p), f32 -> sublane broadcast
        y = jnp.dot(h, w, preferred_element_type=jnp.float32) + b
        if i != num_layers - 1:
            y = jnp.maximum(y, 0.0)          # fused ReLU epilogue (f32)
            h = y.astype(w.dtype)            # narrow only for the next MXU pass
        else:
            h = y
    o_ref[...] = h.astype(o_ref.dtype)


def fully_connected_network(x, params, *, tile_b: int = 512,
                            compute_dtype=jnp.bfloat16):
    """Forward pass. x: (N, C, H, W) -> logits (N, num_classes).

    params: list of (w_t, b); w_t is (in, out) (already transposed vs. nn.Linear),
    b is (1, out). Padding to 128 lanes and dtype casts happen here.
    """
    B = x.shape[0]
    h = x.reshape(B, -1)                     # nn.Flatten (row-major, matches torch NCHW)
    in_dim = h.shape[1]
    num_layers = len(params)
    num_classes = params[-1][1].shape[-1]

    # ---- host-side lane padding (to 128) + operand dtype cast -----------------
    pad_in = _round_up(in_dim, _LANES)
    if pad_in != in_dim:
        h = jnp.pad(h, ((0, 0), (0, pad_in - in_dim)))
    h = h.astype(compute_dtype)

    padded_params = []
    prev = pad_in
    for w_t, b in params:
        fin, fout = w_t.shape
        fout_p = _round_up(fout, _LANES)
        w_p = jnp.zeros((prev, fout_p), compute_dtype).at[:fin, :fout].set(
            w_t.astype(compute_dtype))
        b_p = jnp.zeros((1, fout_p), jnp.float32).at[:, :fout].set(
            b.astype(jnp.float32))
        padded_params.append((w_p, b_p))
        prev = fout_p
    pad_out = prev

    # ---- grid / specs ---------------------------------------------------------
    TILE_B = _choose_tile_b(B, tile_b)
    grid = (pl.cdiv(B, TILE_B),)

    in_specs = [pl.BlockSpec((TILE_B, pad_in), lambda i: (i, 0))]
    flat_inputs = [h]
    # Whole-array VMEM residency: one copy, no double-buffering of constant blocks.
    resident_spec = pl.BlockSpec(memory_space=pltpu.MemorySpace.VMEM)
    for w_p, b_p in padded_params:
        in_specs.extend((resident_spec, resident_spec))
        flat_inputs.extend((w_p, b_p))
    out_spec = pl.BlockSpec((TILE_B, pad_out), lambda i: (i, 0))

    # ---- cost estimate + VMEM budget ------------------------------------------
    flops = 2 * B * sum(w.shape[0] * w.shape[1] for w, _ in params)
    resident_bytes = sum(w.size * w.dtype.itemsize + b.size * b.dtype.itemsize
                         for w, b in padded_params)
    bytes_accessed = (h.size * h.dtype.itemsize + resident_bytes + B * pad_out * 4)
    cost = pl.CostEstimate(flops=flops, transcendentals=0,
                           bytes_accessed=bytes_accessed)

    vmem_need = (2 * TILE_B * pad_in * h.dtype.itemsize       # double-buffered x tile
                 + resident_bytes                             # resident weights/biases
                 + 2 * TILE_B * pad_out * 4)                  # double-buffered out tile
    cparams = {"dimension_semantics": ("parallel",)}
    if vmem_need > (12 << 20):                                # v5e default scoped ~16 MiB
        cparams["vmem_limit_bytes"] = min(2 * vmem_need + (4 << 20), 100 << 20)

    kernel = functools.partial(_mlp_kernel, num_layers=num_layers)
    out_padded = pl.pallas_call(
        kernel,
        out_shape=jax.ShapeDtypeStruct((B, pad_out), jnp.float32),
        grid=grid,
        in_specs=in_specs,
        out_specs=out_spec,
        compiler_params=pltpu.CompilerParams(**cparams),
        cost_estimate=cost,
    )(*flat_inputs)

    return out_padded[:, :num_classes]


def init_params(key, input_shape, hidden_layer_dimensions, num_classes):
    """Deterministic init mimicking nn.Linear default (U(-1/sqrt(fan_in), +))."""
    flatten_size = 1
    for d in input_shape:
        flatten_size *= d
    dims = [flatten_size] + list(hidden_layer_dimensions) + [num_classes]
    params = []
    for i in range(len(dims) - 1):
        fan_in, fan_out = dims[i], dims[i + 1]
        key, kw, kb = jax.random.split(key, 3)
        bound = 1.0 / jnp.sqrt(jnp.float32(fan_in))
        # Stored already transposed to (in, out) for the kernel.
        w_t = jax.random.uniform(kw, (fan_in, fan_out), jnp.float32, -bound, bound)
        b = jax.random.uniform(kb, (1, fan_out), jnp.float32, -bound, bound)
        params.append((w_t, b))
    return params


if __name__ == "__main__":
    key = jax.random.PRNGKey(0)
    kx, kp = jax.random.split(key)

    input_shape = (4, 16, 16)              # (C, H, W) -> flatten 1024
    hidden_layer_dimensions = [32, 32]
    num_classes = 10
    batch = 2

    x = jax.random.normal(kx, (batch,) + input_shape, dtype=jnp.float32)
    params = init_params(kp, input_shape, hidden_layer_dimensions, num_classes)

    out = fully_connected_network(x, params)
    out = jax.block_until_ready(out)

    # Pure-JAX f32 reference (kernel uses bf16 operands -> relaxed tolerance).
    h_ref = x.reshape(batch, -1)
    for i, (w_t, b) in enumerate(params):
        h_ref = h_ref @ w_t + b
        if i != len(params) - 1:
            h_ref = jnp.maximum(h_ref, 0.0)
    assert out.shape == (batch, num_classes)
    assert jnp.allclose(out, h_ref, atol=2e-2, rtol=2e-2), (
        jnp.max(jnp.abs(out - h_ref)))

    print("KERNEL_OK")
</pallas_src>

<mosaic_0001>
module attributes {stable_mosaic.version = 11 : i64} {
  func.func @_mlp_kernel(%arg0: i32, %arg1: memref<2x1024xbf16, #tpu.memory_space<vmem>>, %arg2: memref<1024x128xbf16, #tpu.memory_space<vmem>>, %arg3: memref<1x128xf32, #tpu.memory_space<vmem>>, %arg4: memref<128x128xbf16, #tpu.memory_space<vmem>>, %arg5: memref<1x128xf32, #tpu.memory_space<vmem>>, %arg6: memref<128x128xbf16, #tpu.memory_space<vmem>>, %arg7: memref<1x128xf32, #tpu.memory_space<vmem>>, %arg8: memref<2x128xf32, #tpu.memory_space<vmem>>) attributes {dimension_semantics = [#tpu.dimension_semantics<parallel>], iteration_bounds = array<i64: 1>, scalar_prefetch = 0 : i64, scratch_operands = 0 : i64, tpu.core_type = #tpu.core_type<tc>, window_params = [{transform_indices = @transform_0, window_bounds = array<i64: 2, 1024>}, {pipeline_mode = #tpu.pipeline_mode<synchronous>, transform_indices = @transform_1, window_bounds = array<i64: 1024, 128>}, {pipeline_mode = #tpu.pipeline_mode<synchronous>, transform_indices = @transform_2, window_bounds = array<i64: 1, 128>}, {pipeline_mode = #tpu.pipeline_mode<synchronous>, transform_indices = @transform_3, window_bounds = array<i64: 128, 128>}, {pipeline_mode = #tpu.pipeline_mode<synchronous>, transform_indices = @transform_4, window_bounds = array<i64: 1, 128>}, {pipeline_mode = #tpu.pipeline_mode<synchronous>, transform_indices = @transform_5, window_bounds = array<i64: 128, 128>}, {pipeline_mode = #tpu.pipeline_mode<synchronous>, transform_indices = @transform_6, window_bounds = array<i64: 1, 128>}, {transform_indices = @transform_7, window_bounds = array<i64: 2, 128>}]} {
    %c0 = arith.constant 0 : index
    %c0_0 = arith.constant 0 : index
    %0 = vector.load %arg1[%c0, %c0_0] : memref<2x1024xbf16, #tpu.memory_space<vmem>>, vector<2x1024xbf16>
    %c0_1 = arith.constant 0 : index
    %c0_2 = arith.constant 0 : index
    %1 = vector.load %arg2[%c0_1, %c0_2] : memref<1024x128xbf16, #tpu.memory_space<vmem>>, vector<1024x128xbf16>
    %c0_3 = arith.constant 0 : index
    %c0_4 = arith.constant 0 : index
    %2 = vector.load %arg3[%c0_3, %c0_4] : memref<1x128xf32, #tpu.memory_space<vmem>>, vector<1x128xf32>
    %cst = arith.constant dense<0.000000e+00> : vector<2x128xf32>
    %3 = tpu.matmul %0, %1, %cst {dimension_numbers = #tpu.dot_dimension_numbers<[1], [0], [0], [1], [0, 0, 1, 1], [], []>} : vector<2x1024xbf16>, vector<1024x128xbf16>, vector<2x128xf32> -> vector<2x128xf32>
    %4 = vector.broadcast %2 : vector<1x128xf32> to vector<2x128xf32>
    %5 = arith.addf %3, %4 : vector<2x128xf32>
    %cst_5 = arith.constant 0.000000e+00 : f32
    %6 = vector.broadcast %cst_5 : f32 to vector<2x128xf32>
    %7 = arith.maximumf %5, %6 : vector<2x128xf32>
    %8 = arith.truncf %7 : vector<2x128xf32> to vector<2x128xbf16>
    %c0_6 = arith.constant 0 : index
    %c0_7 = arith.constant 0 : index
    %9 = vector.load %arg4[%c0_6, %c0_7] : memref<128x128xbf16, #tpu.memory_space<vmem>>, vector<128x128xbf16>
    %c0_8 = arith.constant 0 : index
    %c0_9 = arith.constant 0 : index
    %10 = vector.load %arg5[%c0_8, %c0_9] : memref<1x128xf32, #tpu.memory_space<vmem>>, vector<1x128xf32>
    %cst_10 = arith.constant dense<0.000000e+00> : vector<2x128xf32>
    %11 = tpu.matmul %8, %9, %cst_10 {dimension_numbers = #tpu.dot_dimension_numbers<[1], [0], [0], [1], [0, 0, 1, 1], [], []>} : vector<2x128xbf16>, vector<128x128xbf16>, vector<2x128xf32> -> vector<2x128xf32>
    %12 = vector.broadcast %10 : vector<1x128xf32> to vector<2x128xf32>
    %13 = arith.addf %11, %12 : vector<2x128xf32>
    %cst_11 = arith.constant 0.000000e+00 : f32
    %14 = vector.broadcast %cst_11 : f32 to vector<2x128xf32>
    %15 = arith.maximumf %13, %14 : vector<2x128xf32>
    %16 = arith.truncf %15 : vector<2x128xf32> to vector<2x128xbf16>
    %c0_12 = arith.constant 0 : index
    %c0_13 = arith.constant 0 : index
    %17 = vector.load %arg6[%c0_12, %c0_13] : memref<128x128xbf16, #tpu.memory_space<vmem>>, vector<128x128xbf16>
    %c0_14 = arith.constant 0 : index
    %c0_15 = arith.constant 0 : index
    %18 = vector.load %arg7[%c0_14, %c0_15] : memref<1x128xf32, #tpu.memory_space<vmem>>, vector<1x128xf32>
    %cst_16 = arith.constant dense<0.000000e+00> : vector<2x128xf32>
    %19 = tpu.matmul %16, %17, %cst_16 {dimension_numbers = #tpu.dot_dimension_numbers<[1], [0], [0], [1], [0, 0, 1, 1], [], []>} : vector<2x128xbf16>, vector<128x128xbf16>, vector<2x128xf32> -> vector<2x128xf32>
    %20 = vector.broadcast %18 : vector<1x128xf32> to vector<2x128xf32>
    %21 = arith.addf %19, %20 : vector<2x128xf32>
    %c0_17 = arith.constant 0 : index
    %c0_18 = arith.constant 0 : index
    %22 = vector.load %arg8[%c0_17, %c0_18] : memref<2x128xf32, #tpu.memory_space<vmem>>, vector<2x128xf32>
    tpu.vector_store %arg8[%c0_17, %c0_18], %21 {strides = array<i32>} : memref<2x128xf32, #tpu.memory_space<vmem>>, vector<2x128xf32>,
    return
  }
  func.func @transform_0(%arg0: i32) -> (i32, i32) {
    %c0_i32 = arith.constant 0 : i32
    %c0_i32_0 = arith.constant 0 : i32
    return %arg0, %c0_i32 : i32, i32
  }
  func.func @transform_1(%arg0: i32) -> (i32, i32) {
    %c0_i32 = arith.constant 0 : i32
    %c0_i32_0 = arith.constant 0 : i32
    %c0_i32_1 = arith.constant 0 : i32
    return %c0_i32, %c0_i32_0 : i32, i32
  }
  func.func @transform_2(%arg0: i32) -> (i32, i32) {
    %c0_i32 = arith.constant 0 : i32
    %c0_i32_0 = arith.constant 0 : i32
    %c0_i32_1 = arith.constant 0 : i32
    return %c0_i32, %c0_i32_0 : i32, i32
  }
  func.func @transform_3(%arg0: i32) -> (i32, i32) {
    %c0_i32 = arith.constant 0 : i32
    %c0_i32_0 = arith.constant 0 : i32
    %c0_i32_1 = arith.constant 0 : i32
    return %c0_i32, %c0_i32_0 : i32, i32
  }
  func.func @transform_4(%arg0: i32) -> (i32, i32) {
    %c0_i32 = arith.constant 0 : i32
    %c0_i32_0 = arith.constant 0 : i32
    %c0_i32_1 = arith.constant 0 : i32
    return %c0_i32, %c0_i32_0 : i32, i32
  }
  func.func @transform_5(%arg0: i32) -> (i32, i32) {
    %c0_i32 = arith.constant 0 : i32
    %c0_i32_0 = arith.constant 0 : i32
    %c0_i32_1 = arith.constant 0 : i32
    return %c0_i32, %c0_i32_0 : i32, i32
  }
  func.func @transform_6(%arg0: i32) -> (i32, i32) {
    %c0_i32 = arith.constant 0 : i32
    %c0_i32_0 = arith.constant 0 : i32
    %c0_i32_1 = arith.constant 0 : i32
    return %c0_i32, %c0_i32_0 : i32, i32
  }
  func.func @transform_7(%arg0: i32) -> (i32, i32) {
    %c0_i32 = arith.constant 0 : i32
    %c0_i32_0 = arith.constant 0 : i32
    return %arg0, %c0_i32 : i32, i32
  }
}

</mosaic_0001>

<bundles_post_ra>
// kernel: tpu_custom_call.1
= control target key start
LH: loop header
LB: loop body
LE: loop exit
PB: predicated region body
PF: predicated region fallthrough
CT: control target
= control target key end

     0   :  { %12 = vsyncpa [#allocation3], 0  ;;  %s1522_s0 = inlined_call_operand.hbm [shape: bf16[2,1024], index: 0, kind: input, shape index: {}]   ;;  %s1523_s1 = inlined_call_operand.hbm [shape: bf16[1024,128], index: 1, kind: input, shape index: {}]   ;;  %s1524_s2 = inlined_call_operand.vmem [shape: f32[1,128], index: 2, kind: input, shape index: {}]   ;;  %s1525_s3 = inlined_call_operand.hbm [shape: bf16[128,128], index: 3, kind: input, shape index: {}]   ;;  %s1526_s4 = inlined_call_operand.vmem [shape: f32[1,128], index: 4, kind: input, shape index: {}]   ;;  %s1527_s5 = inlined_call_operand.hbm [shape: bf16[128,128], index: 5, kind: input, shape index: {}]   ;;  %s1528_s6 = inlined_call_operand.vmem [shape: f32[1,128], index: 6, kind: input, shape index: {}]   ;;  %s1529_s7 = inlined_call_operand.hbm [shape: f32[2,128], index: 7, kind: output, shape index: {}]  }
   0x1   :  { %13 = vsyncpa [#allocation6], 0 }
   0x2   :  { %14 = vsyncpa [#allocation9], 0  ;;  %s31_s26 = sshll.u32 %s1523_s1, 4  ;;  %s32_s26 = int_to_ptr.hbm [resolvable:$true] %s31_s26 }
   0x3   :  { %15 = vsyncpa [#allocation4], 0  ;;  %s1451_s27 = smov [#allocation5]   ;;  %s21_s8 = sshll.u32 %s1522_s0, 4  ;;  %s22_s8 = int_to_ptr.hbm [resolvable:$true] %s21_s8 }
   0x4   :  { %s33_s28 = sshll.u32 %s1451_s27, 4  ;;  %s1452_s9 = smov 64   ;;  %s34_s28 = int_to_ptr.vmem [resolvable:$true] %s33_s28 }
   0x5   :  { %s1453_s10 = smov 4   ;;  %s1454_s11 = smov [#allocation2]  }
   0x6   :  { %39 = dma.hbm_to_vmem [thread:$0]  %s32_s26, 8192, %s34_s28, [#allocation6], %s1452_s9, %s1452_s9, %s1453_s10  }
   0x7   :  { %s23_s12 = sshll.u32 %s1454_s11, 4  ;;  %s46_s15 = sshll.u32 %s1525_s3, 4  ;;  %s24_s12 = int_to_ptr.vmem [resolvable:$true] %s23_s12  ;;  %s47_s15 = int_to_ptr.hbm [resolvable:$true] %s46_s15 }
   0x8   :  { %26 = dma.hbm_to_vmem [thread:$0]  %s22_s8, 128, %s24_s12, [#allocation3]  }
   0x9   :  { %s61_s17 = sshll.u32 %s1527_s5, 4  ;;  %s1455_s18 = smov [#allocation7]   ;;  %s62_s17 = int_to_ptr.hbm [resolvable:$true] %s61_s17 }
   0xa   :  { %s48_s19 = sshll.u32 %s1455_s18, 4  ;;  %s1456_s0 = smov [#allocation8]   ;;  %s49_s19 = int_to_ptr.vmem [resolvable:$true] %s48_s19 }
   0xb   :  { %54 = dma.hbm_to_vmem [thread:$0]  %s47_s15, 1024, %s49_s19, [#allocation6], %s1452_s9, %s1452_s9, %s1453_s10  }
   0xc   :  { %s63_s20 = sshll.u32 %s1456_s0, 4  ;;  %s64_s20 = int_to_ptr.vmem [resolvable:$true] %s63_s20 }
   0xd   :  { %69 = dma.hbm_to_vmem [thread:$0]  %s62_s17, 1024, %s64_s20, [#allocation9], %s1452_s9, %s1452_s9, %s1453_s10  }
   0xe   :  { %1443 = dma.done.wait [#allocation3], 128  }
   0xf   :  { %1444 = vsyncadd [#allocation3], 4294967168 }
  0x10   :  { %1445 = dma.done.wait [#allocation6], 9216  }
  0x11   :  { %1446 = vsyncadd [#allocation6], 4294958080 }
  0x12   :  { %1447 = dma.done.wait [#allocation9], 1024  }
  0x13   :  { %1448 = vsyncadd [#allocation9], 4294966272  ;;  %v1240_v0 = vld [vmem:[#allocation5 + $0x38] sm:$0xff]  ;;  %v1239_v4 = vld [vmem:[#allocation5 + $0x30] sm:$0xff]  ;;  %s1457_s24 = smov [#allocation10]   ;;  %s901_s28 = sshll.u32 %s1529_s7, 4  ;;  %s902_s28 = int_to_ptr.hbm [resolvable:$true] %s901_s28 }
  0x14   :  { %v1248_v1 = vld [vmem:[#allocation5 + $0x78] sm:$0xff]  ;;  %623 = vmatpush.bf16.msra.mxu0 %v1240_v0  ;;  %v1247_v5 = vld [vmem:[#allocation5 + $0x70] sm:$0xff]  ;;  %v1238_v8 = vld [vmem:[#allocation5 + $0x28] sm:$0xff]  ;;  %s899_s25 = sshll.u32 %s1457_s24, 4  ;;  %s900_s25 = int_to_ptr.vmem [resolvable:$true] %s899_s25 }
  0x15   :  { %v1256_v2 = vld [vmem:[#allocation5 + $0xb8] sm:$0xff]  ;;  %636 = vmatpush.bf16.msra.mxu1 %v1248_v1  ;;  %v1255_v6 = vld [vmem:[#allocation5 + $0xb0] sm:$0xff]  ;;  %v1246_v9 = vld [vmem:[#allocation5 + $0x68] sm:$0xff] }
  0x16   :  { %v1264_v3 = vld [vmem:[#allocation5 + $0xf8] sm:$0xff]  ;;  %649 = vmatpush.bf16.msra.mxu2 %v1256_v2  ;;  %v1263_v7 = vld [vmem:[#allocation5 + $0xf0] sm:$0xff]  ;;  %v1254_v10 = vld [vmem:[#allocation5 + $0xa8] sm:$0xff] }
  0x17   :  { %662 = vmatpush.bf16.msra.mxu3 %v1264_v3  ;;  %v1262_v11 = vld [vmem:[#allocation5 + $0xe8] sm:$0xff]  ;;  %v1237_v12 = vld [vmem:[#allocation5 + $0x20] sm:$0xff]  ;;  %v88_v16 = vld [vmem:[#allocation2] sm:$0xff] }
  0x18   :  { %624 = vmatpush.bf16.msra.mxu0 %v1239_v4  ;;  %v1245_v13 = vld [vmem:[#allocation5 + $0x60] sm:$0xff]  ;;  %v1236_v17 = vld [vmem:[#allocation5 + $0x18] sm:$0xff]  ;;  %222 = vst [vmem:[#allocation1] ss:$9 sm:$0xff] %v88_v16  ;;  %v1235_v21 = vld [vmem:[#allocation5 + $0x10] sm:$0xff] }
  0x19   :  { %637 = vmatpush.bf16.msra.mxu1 %v1247_v5  ;;  %v1253_v14 = vld [vmem:[#allocation5 + $0xa0] sm:$0xff]  ;;  %v1244_v18 = vld [vmem:[#allocation5 + $0x58] sm:$0xff]  ;;  %v1243_v22 = vld [vmem:[#allocation5 + $0x50] sm:$0xff] }
  0x1a   :  { %650 = vmatpush.bf16.msra.mxu2 %v1255_v6  ;;  %v1261_v15 = vld [vmem:[#allocation5 + $0xe0] sm:$0xff]  ;;  %v1252_v19 = vld [vmem:[#allocation5 + $0x98] sm:$0xff]  ;;  %v1251_v23 = vld [vmem:[#allocation5 + $0x90] sm:$0xff] }
  0x1b   :  { %663 = vmatpush.bf16.msra.mxu3 %v1263_v7  ;;  %v1260_v20 = vld [vmem:[#allocation5 + $0xd8] sm:$0xff]  ;;  %v1259_v24 = vld [vmem:[#allocation5 + $0xd0] sm:$0xff]  ;;  %v1234_v25 = vld [vmem:[#allocation5 + $0x8] sm:$0xff] }
  0x1c   :  { %625 = vmatpush.bf16.msra.mxu0 %v1238_v8  ;;  %v1242_v26 = vld [vmem:[#allocation5 + $0x48] sm:$0xff]  ;;  %v1233_v29 = vld [vmem:[#allocation5] sm:$0xff]  ;;  %v1272_v33 = vld [vmem:[#allocation5 + $0x138] sm:$0xff] }
  0x1d   :  { %638 = vmatpush.bf16.msra.mxu1 %v1246_v9  ;;  %v1250_v27 = vld [vmem:[#allocation5 + $0x88] sm:$0xff]  ;;  %v1241_v30 = vld [vmem:[#allocation5 + $0x40] sm:$0xff]  ;;  %v1280_v34 = vld [vmem:[#allocation5 + $0x178] sm:$0xff] }
  0x1e   :  { %651 = vmatpush.bf16.msra.mxu2 %v1254_v10  ;;  %v1258_v28 = vld [vmem:[#allocation5 + $0xc8] sm:$0xff]  ;;  %v1249_v31 = vld [vmem:[#allocation5 + $0x80] sm:$0xff]  ;;  %v1288_v35 = vld [vmem:[#allocation5 + $0x1b8] sm:$0xff] }
  0x1f   :  { %664 = vmatpush.bf16.msra.mxu3 %v1262_v11  ;;  %v1257_v32 = vld [vmem:[#allocation5 + $0xc0] sm:$0xff]  ;;  %v1296_v36 = vld [vmem:[#allocation5 + $0x1f8] sm:$0xff]  ;;  %v1271_v37 = vld [vmem:[#allocation5 + $0x130] sm:$0xff] }
  0x20   :  { %626 = vmatpush.bf16.msra.mxu0 %v1237_v12  ;;  %v225_v38 = vld [vmem:[#allocation1 + $0x12] sm:$0xff]  ;;  %v223_v39 = vld [vmem:[#allocation1] sm:$0xff]  ;;  %v224_v42 = vld [vmem:[#allocation1 + $0x9] sm:$0xff] }
  0x21   :  { %639 = vmatpush.bf16.msra.mxu1 %v1245_v13  ;;  %v1279_v40 = vld [vmem:[#allocation5 + $0x170] sm:$0xff]  ;;  %v1270_v45 = vld [vmem:[#allocation5 + $0x128] sm:$0xff]  ;;  %v1269_v49 = vld [vmem:[#allocation5 + $0x120] sm:$0xff] }
  0x22   :  { %652 = vmatpush.bf16.msra.mxu2 %v1253_v14  ;;  %v226_v41 = vld [vmem:[#allocation1 + $0x1b] sm:$0xff]  ;;  %v1277_v50 = vld [vmem:[#allocation5 + $0x160] sm:$0xff]  ;;  %v1268_v53 = vld [vmem:[#allocation5 + $0x118] sm:$0xff] }
  0x23   :  { %665 = vmatpush.bf16.msra.mxu3 %v1261_v15  ;;  %v1287_v43 = vld [vmem:[#allocation5 + $0x1b0] sm:$0xff]  ;;  %v1278_v46 = vld [vmem:[#allocation5 + $0x168] sm:$0xff]  ;;  %v1285_v51 = vld [vmem:[#allocation5 + $0x1a0] sm:$0xff] }
  0x24   :  { %627 = vmatpush.bf16.msra.mxu0 %v1236_v17  ;;  %v1295_v44 = vld [vmem:[#allocation5 + $0x1f0] sm:$0xff]  ;;  %v1286_v47 = vld [vmem:[#allocation5 + $0x1a8] sm:$0xff]  ;;  %v1293_v52 = vld [vmem:[#allocation5 + $0x1e0] sm:$0xff] }
  0x25   :  { %640 = vmatpush.bf16.msra.mxu1 %v1244_v18  ;;  %v1294_v48 = vld [vmem:[#allocation5 + $0x1e8] sm:$0xff]  ;;  %v1276_v54 = vld [vmem:[#allocation5 + $0x158] sm:$0xff]  ;;  %v1267_v57 = vld [vmem:[#allocation5 + $0x110] sm:$0xff] }
  0x26   :  { %653 = vmatpush.bf16.msra.mxu2 %v1252_v19  ;;  %v1284_v55 = vld [vmem:[#allocation5 + $0x198] sm:$0xff]  ;;  %v1275_v58 = vld [vmem:[#allocation5 + $0x150] sm:$0xff]  ;;  %v1266_v61 = vld [vmem:[#allocation5 + $0x108] sm:$0xff] }
  0x27   :  { %666 = vmatpush.bf16.msra.mxu3 %v1260_v20  ;;  %v1292_v56 = vld [vmem:[#allocation5 + $0x1d8] sm:$0xff]  ;;  %v1283_v59 = vld [vmem:[#allocation5 + $0x190] sm:$0xff]  ;;  %v1274_v62 = vld [vmem:[#allocation5 + $0x148] sm:$0xff] }
  0x28   :  { %628 = vmatpush.bf16.msra.mxu0 %v1235_v21  ;;  %v1291_v60 = vld [vmem:[#allocation5 + $0x1d0] sm:$0xff]  ;;  %v1282_v63 = vld [vmem:[#allocation5 + $0x188] sm:$0xff]  ;;  %v1265_v1 = vld [vmem:[#allocation5 + $0x100] sm:$0xff] }
  0x29   :  { %641 = vmatpush.bf16.msra.mxu1 %v1243_v22  ;;  %v1290_v0 = vld [vmem:[#allocation5 + $0x1c8] sm:$0xff]  ;;  %v1273_v2 = vld [vmem:[#allocation5 + $0x140] sm:$0xff]  ;;  %v227_v5 = vld [vmem:[#allocation1 + $0x24] sm:$0xff] }
  0x2a   :  { %654 = vmatpush.bf16.msra.mxu2 %v1251_v23  ;;  %v1281_v3 = vld [vmem:[#allocation5 + $0x180] sm:$0xff]  ;;  %v230_v8 = vld [vmem:[#allocation1 + $0x3f] sm:$0xff]  ;;  %v1304_v9 = vld [vmem:[#allocation7 + $0x38] sm:$0xff] }
  0x2b   :  { %667 = vmatpush.bf16.msra.mxu3 %v1259_v24  ;;  %v1289_v4 = vld [vmem:[#allocation5 + $0x1c0] sm:$0xff]  ;;  %v1303_v10 = vld [vmem:[#allocation7 + $0x30] sm:$0xff]  ;;  %v1302_v11 = vld [vmem:[#allocation7 + $0x28] sm:$0xff] }
  0x2c   :  { %629 = vmatpush.bf16.msra.mxu0 %v1234_v25  ;;  %v228_v6 = vld [vmem:[#allocation1 + $0x2d] sm:$0xff]  ;;  %v229_v7 = vld [vmem:[#allocation1 + $0x36] sm:$0xff]  ;;  %v1299_v15 = vld [vmem:[#allocation7 + $0x10] sm:$0xff] }
  0x2d   :  { %642 = vmatpush.bf16.msra.mxu1 %v1242_v26  ;;  %v1301_v12 = vld [vmem:[#allocation7 + $0x20] sm:$0xff]  ;;  %v1300_v13 = vld [vmem:[#allocation7 + $0x18] sm:$0xff]  ;;  %v1298_v17 = vld [vmem:[#allocation7 + $0x8] sm:$0xff] }
  0x2e   :  { %655 = vmatpush.bf16.msra.mxu2 %v1250_v27  ;;  %v1297_v21 = vld [vmem:[#allocation7] sm:$0xff]  ;;  %v1320_v23 = vld [vmem:[%s1524_s2] ss:$0 sm:$0xff]  ;;  %v1312_v24 = vld [vmem:[#allocation8 + $0x38] sm:$0xff] }
  0x2f   :  { %668 = vmatpush.bf16.msra.mxu3 %v1258_v28  ;;  %v1311_v27 = vld [vmem:[#allocation8 + $0x30] sm:$0xff] }
  0x30   :  { %630 = vmatpush.bf16.msra.mxu0 %v1233_v29  ;;  %v1310_v29 = vld [vmem:[#allocation8 + $0x28] sm:$0xff] }
  0x31   :  { %643 = vmatpush.bf16.msra.mxu1 %v1241_v30 }
  0x32   :  { %656 = vmatpush.bf16.msra.mxu2 %v1249_v31  ;;  %v1309_v31 = vld [vmem:[#allocation8 + $0x20] sm:$0xff] }
  0x33   :  { %669 = vmatpush.bf16.msra.mxu3 %v1257_v32  ;;  %631 = vmatmul.bf16.vlgmr.msra.gmra.mxu0 %v223_v39 }
  0x34   :  { %675 = vmatpush.bf16.msrb.mxu0 %v1272_v33  ;;  %644 = vmatmul.bf16.vlgmr.msra.gmra.mxu1 %v224_v42  ;;  %v1308_v33 = vld [vmem:[#allocation8 + $0x18] sm:$0xff] }
  0x35   :  { %688 = vmatpush.bf16.msrb.mxu1 %v1280_v34  ;;  %657 = vmatmul.bf16.vlgmr.msra.gmra.mxu2 %v225_v38  ;;  %v1307_v38 = vld [vmem:[#allocation8 + $0x10] sm:$0xff] }
  0x36   :  { %701 = vmatpush.bf16.msrb.mxu2 %v1288_v35  ;;  %670 = vmatmul.bf16.vlgmr.msra.gmra.mxu3 %v226_v41 }
  0x37   :  { %714 = vmatpush.bf16.msrb.mxu3 %v1296_v36 }
  0x38   :  { %676 = vmatpush.bf16.msrb.mxu0 %v1271_v37 }
  0x39   :  { %689 = vmatpush.bf16.msrb.mxu1 %v1279_v40 }
  0x3a   :  { %702 = vmatpush.bf16.msrb.mxu2 %v1287_v43 }
  0x3b   :  { %715 = vmatpush.bf16.msrb.mxu3 %v1295_v44 }
  0x3c   :  { %677 = vmatpush.bf16.msrb.mxu0 %v1270_v45 }
  0x3d   :  { %690 = vmatpush.bf16.msrb.mxu1 %v1278_v46 }
  0x3e   :  { %703 = vmatpush.bf16.msrb.mxu2 %v1286_v47 }
  0x3f   :  { %716 = vmatpush.bf16.msrb.mxu3 %v1294_v48 }
  0x40   :  { %678 = vmatpush.bf16.msrb.mxu0 %v1269_v49 }
  0x41   :  { %691 = vmatpush.bf16.msrb.mxu1 %v1277_v50  ;;  %v1306_v50 = vld [vmem:[#allocation8 + $0x8] sm:$0xff] }
  0x42   :  { %704 = vmatpush.bf16.msrb.mxu2 %v1285_v51  ;;  %v1305_v51 = vld [vmem:[#allocation8] sm:$0xff] }
  0x43   :  { %717 = vmatpush.bf16.msrb.mxu3 %v1293_v52  ;;  %v1321_v52 = vld [vmem:[%s1526_s4] ss:$0 sm:$0xff] }
  0x44   :  { %679 = vmatpush.bf16.msrb.mxu0 %v1268_v53 }
  0x45   :  { %692 = vmatpush.bf16.msrb.mxu1 %v1276_v54 }
  0x46   :  { %705 = vmatpush.bf16.msrb.mxu2 %v1284_v55 }
  0x47   :  { %718 = vmatpush.bf16.msrb.mxu3 %v1292_v56 }
  0x48   :  { %680 = vmatpush.bf16.msrb.mxu0 %v1267_v57 }
  0x49   :  { %693 = vmatpush.bf16.msrb.mxu1 %v1275_v58  ;;  %v1322_v58 = vld [vmem:[%s1528_s6] ss:$0 sm:$0xff] }
  0x4a   :  { %706 = vmatpush.bf16.msrb.mxu2 %v1283_v59 }
  0x4b   :  { %719 = vmatpush.bf16.msrb.mxu3 %v1291_v60 }
  0x4c   :  { %681 = vmatpush.bf16.msrb.mxu0 %v1266_v61 }
  0x4d   :  { %694 = vmatpush.bf16.msrb.mxu1 %v1274_v62 }
  0x4e   :  { %707 = vmatpush.bf16.msrb.mxu2 %v1282_v63 }
  0x4f   :  { %720 = vmatpush.bf16.msrb.mxu3 %v1290_v0 }
  0x50   :  { %682 = vmatpush.bf16.msrb.mxu0 %v1265_v1 }
  0x51   :  { %695 = vmatpush.bf16.msrb.mxu1 %v1273_v2 }
  0x52   :  { %708 = vmatpush.bf16.msrb.mxu2 %v1281_v3 }
  0x53   :  { %721 = vmatpush.bf16.msrb.mxu3 %v1289_v4  ;;  %683 = vmatmul.bf16.vlgmr.msrb.gmra.mxu0 %v227_v5 }
  0x54   :  { %696 = vmatmul.bf16.vlgmr.msrb.gmra.mxu1 %v228_v6  ;;  %797 = vmatpush.bf16.msra.mxu0 %v1304_v9 }
  0x55   :  { %709 = vmatmul.bf16.vlgmr.msrb.gmra.mxu2 %v229_v7  ;;  %880 = vmatpush.bf16.msra.mxu1 %v1312_v24 }
  0x56   :  { %722 = vmatmul.bf16.vlgmr.msrb.gmra.mxu3 %v230_v8 }
  0x58   :  { %798 = vmatpush.bf16.msra.mxu0 %v1303_v10 }
  0x59   :  { %881 = vmatpush.bf16.msra.mxu1 %v1311_v27 }
  0x5c   :  { %799 = vmatpush.bf16.msra.mxu0 %v1302_v11 }
  0x5d   :  { %882 = vmatpush.bf16.msra.mxu1 %v1310_v29 }
  0x60   :  { %800 = vmatpush.bf16.msra.mxu0 %v1301_v12 }
  0x61   :  { %883 = vmatpush.bf16.msra.mxu1 %v1309_v31 }
  0x64   :  { %801 = vmatpush.bf16.msra.mxu0 %v1300_v13 }
  0x65   :  { %884 = vmatpush.bf16.msra.mxu1 %v1308_v33 }
  0x68   :  { %802 = vmatpush.bf16.msra.mxu0 %v1299_v15 }
  0x69   :  { %885 = vmatpush.bf16.msra.mxu1 %v1307_v38 }
  0x6c   :  { %803 = vmatpush.bf16.msra.mxu0 %v1298_v17 }
  0x6d   :  { %886 = vmatpush.bf16.msra.mxu1 %v1306_v50 }
  0x70   :  { %804 = vmatpush.bf16.msra.mxu0 %v1297_v21 }
  0x71   :  { %887 = vmatpush.bf16.msra.mxu1 %v1305_v51 }
  0xb0   :  { %v632_v14 = vpop.f32.mrf.mxu0 }
  0xb1   :  { %v645_v16 = vpop.f32.mrf.mxu1  ;;  %v633_v28 = vadd.f32 %v1320_v23, %v632_v14 }
  0xb3   :  { %v646_v30 = vadd.f32 %v645_v16, %v633_v28 }
  0xb8   :  { %v658_v18 = vpop.f32.mrf.mxu2  ;;  %v634_v20 = vpop.f32.mrf.mxu0 }
  0xb9   :  { %v671_v19 = vpop.f32.mrf.mxu3  ;;  %v647_v22 = vpop.f32.mrf.mxu1  ;;  %v659_v32 = vadd.f32 %v658_v18, %v646_v30 }
  0xbb   :  { %v672_v34 = vadd.f32 %v671_v19, %v659_v32 }
  0xc0   :  { %v660_v25 = vpop.f32.mrf.mxu2 }
  0xc1   :  { %v673_v26 = vpop.f32.mrf.mxu3 }
  0xd0   :  { %v684_v35 = vpop.f32.mrf.mxu0 }
  0xd1   :  { %v697_v36 = vpop.f32.mrf.mxu1  ;;  %v685_v37 = vadd.f32 %v684_v35, %v672_v34 }
  0xd3   :  { %v698_v39 = vadd.f32 %v697_v36, %v685_v37 }
  0xd8   :  { %v710_v40 = vpop.f32.mrf.mxu2  ;;  %v686_v43 = vpop.f32.mrf.mxu0 }
  0xd9   :  { %v723_v41 = vpop.f32.mrf.mxu3  ;;  %v711_v42 = vadd.f32 %v710_v40, %v698_v39  ;;  %v699_v44 = vpop.f32.mrf.mxu1 }
  0xdb   :  { %v724_v45 = vadd.f32 %v723_v41, %v711_v42 }
  0xdd   :  { %v727_v46 = vmax.f32 %v724_v45, 0.0 }
  0xdf   :  { %v728_v47 = vpack.c.bf16 %v727_v46, %v727_v46 }
  0xe0   :  { %v712_v48 = vpop.f32.mrf.mxu2 }
  0xe1   :  { %v725_v49 = vpop.f32.mrf.mxu3  ;;  %805 = vmatmul.bf16.vlgmr.msra.gmra.mxu0 %v728_v47 }
 0x15e   :  { %v806_v53 = vpop.f32.mrf.mxu0 }
 0x15f   :  { %v807_v54 = vadd.f32 %v1321_v52, %v806_v53 }
 0x161   :  { %v810_v55 = vmax.f32 %v807_v54, 0.0 }
 0x163   :  { %v811_v56 = vpack.c.bf16 %v810_v55, %v810_v55 }
 0x165   :  { %888 = vmatmul.bf16.vlgmr.msra.gmra.mxu1 %v811_v56 }
 0x166   :  { %v808_v57 = vpop.f32.mrf.mxu0 }
 0x1e2   :  { %v889_v59 = vpop.f32.mrf.mxu1 }
 0x1e3   :  { %v890_v60 = vadd.f32 %v1322_v58, %v889_v59 }
 0x1e5   :  { %893 = vst [vmem:[#allocation10] sm:$0x3] %v890_v60 }
 0x1e6   :  { %904 = dma.vmem_to_hbm [thread:$0]  %s900_s25, 32, %s902_s28, [#allocation4]  }
 0x1ea   :  { %v891_v61 = vpop.f32.mrf.mxu1 }
 0x1eb   :  { %1449 = dma.done.wait [#allocation4], 32  }
 0x1ec   :  { %1450 = vsyncadd [#allocation4], 4294967264 }
 0x1ed   :  { %909 = vsyncpa [#allocation3], 1 }
 0x1ee   :  { %910 = vsyncpa [#allocation6], 1 }
 0x1ef   :  { %911 = vsyncpa [#allocation9], 1 }
 0x1f0   :  { %912 = vsyncpa [#allocation4], 1 }

</bundles_post_ra>
